<compile_context>
chip_gen: v7x
topology: tpu7x:2x2x1
jax: 0.10.0
libtpu: 0.0.40
codegen_flags: <defaults>
</compile_context>

<pallas_src>
import jax
import jax.numpy as jnp
from jax.experimental import pallas as pl
from jax.experimental.pallas import tpu as pltpu


def _exp_kernel(x_ref, o_ref):
    # Elementwise exp on the current VMEM tile (EUP transcendental path).
    o_ref[...] = jnp.exp(x_ref[...])


def _sublane_granule(dtype) -> int:
    """Minimum row granularity for the (sublane, 128) tiling, per dtype width."""
    itemsize = jnp.dtype(dtype).itemsize
    if itemsize >= 4:
        return 8
    if itemsize == 2:
        return 16
    return 32


def _hw_tuned_params():
    """(tile_bytes, vmem_limit_bytes) tuned per TPU generation, with a safe fallback."""
    tile_bytes = 6 * 1024 * 1024        # safe sweet spot on v7x (64 MiB physical VMEM)
    vmem_limit = 32 * 1024 * 1024       # 4 double-buffered tiles (24 MiB) + scratch
    try:
        info = pltpu.get_tpu_info()
        cap = getattr(info, "vmem_capacity_bytes", None)
        if cap is not None and cap >= 96 * 1024 * 1024:
            # v5e / v6e: 128 MiB physical VMEM -> bigger tiles, raised scoped limit.
            tile_bytes = 8 * 1024 * 1024
            vmem_limit = 48 * 1024 * 1024
    except Exception:
        pass
    return tile_bytes, vmem_limit


def exp_pallas(
    x: jax.Array,
    *,
    tile_bytes: int | None = None,
    vmem_limit_bytes: int | None = None,
    small_fallback_bytes: int = 512 * 1024,
) -> jax.Array:
    """Elementwise exp via a Pallas TPU kernel. Accepts any shape (NCHW expected)."""
    orig_shape = x.shape
    dtype = x.dtype
    total = x.size
    if total == 0:
        return x

    itemsize = jnp.dtype(dtype).itemsize

    # Tiny inputs: let XLA handle/fuse them; a standalone custom call only adds
    # launch overhead and defeats elementwise fusion with neighbors.
    if total * itemsize < small_fallback_bytes:
        return jnp.exp(x)

    default_tile, default_limit = _hw_tuned_params()
    if tile_bytes is None:
        tile_bytes = default_tile
    if vmem_limit_bytes is None:
        vmem_limit_bytes = default_limit

    LANES = 128
    granule = _sublane_granule(dtype)

    flat = jnp.ravel(x)
    # Pad only to a multiple of LANES; sublane raggedness is handled by the
    # cdiv-masked last grid block (block row count stays a granule multiple).
    padded_total = ((total + LANES - 1) // LANES) * LANES
    needs_pad = padded_total != total
    if needs_pad:
        # TODO(synk): for ragged sizes, the input-side pad could be removed by
        # masking tail writes in-kernel (scalar-prefetched element count); only
        # the final slice would remain on the wrapper side.
        flat = jnp.pad(flat, (0, padded_total - total))

    rows = padded_total // LANES
    x2d = flat.reshape(rows, LANES)

    # ~tile_bytes per block, rounded to a multiple of the sublane granule.
    tr = max(granule, (tile_bytes // (LANES * itemsize)) // granule * granule)
    if rows >= 2 * granule:
        # Ensure at least 2 grid steps so the "parallel" axis can be split
        # across both TensorCores on v7x, keeping the work roughly balanced.
        half = -(-rows // 2)                      # ceil(rows / 2)
        half = -(-half // granule) * granule      # round up to granule
        tr = min(tr, half)
    else:
        tr = min(tr, rows)                        # single full-extent block

    grid = (pl.cdiv(rows, tr),)  # ragged last block is masked by Pallas

    cost = pl.CostEstimate(
        flops=0,
        transcendentals=padded_total,
        bytes_accessed=2 * padded_total * itemsize,
    )

    out2d = pl.pallas_call(
        _exp_kernel,
        out_shape=jax.ShapeDtypeStruct((rows, LANES), dtype),
        grid_spec=pltpu.PrefetchScalarGridSpec(
            num_scalar_prefetch=0,
            grid=grid,
            in_specs=[pl.BlockSpec((tr, LANES), lambda i: (i, 0))],
            out_specs=pl.BlockSpec((tr, LANES), lambda i: (i, 0)),
        ),
        compiler_params=pltpu.CompilerParams(
            dimension_semantics=("parallel",),
            vmem_limit_bytes=vmem_limit_bytes,
        ),
        cost_estimate=cost,
    )(x2d)

    if needs_pad:
        out_flat = out2d.reshape(-1)[:total]
        return out_flat.reshape(orig_shape)
    # Divisible fast path: reshape of a contiguous array is a free bitcast.
    return out2d.reshape(orig_shape)


class ExpPallas:
    """JAX/Pallas port of the `Exp` module (concrete-tensor forward path)."""

    def __init__(self, dims=None):
        self.dims = dims
        self.bounds = None
        # nn.Parameter(-torch.ones(dims)) — deterministic init, unused in the
        # concrete forward but kept for parity with the PyTorch module.
        self.deepz_lambda = -jnp.ones(dims, dtype=jnp.float32) if dims is not None else None

    def get_neurons(self):
        n = 1
        for d in self.dims:
            n *= d
        return n

    def reset_bounds(self):
        self.bounds = None

    def __call__(self, x):
        # TODO(synk): HybridZonotope abstract-domain path (x.exp(deepz_lambda, bounds))
        # has no Pallas equivalent here; only the concrete tensor path is implemented.
        return exp_pallas(x)


if __name__ == "__main__":
    key = jax.random.PRNGKey(0)

    # 1) Small NCHW input consistent with the module's elementwise forward
    #    (goes through the small-input fast path; semantics identical).
    x = jax.random.normal(key, (2, 4, 16, 16), dtype=jnp.float32)
    layer = ExpPallas(dims=(4, 16, 16))
    out = jax.block_until_ready(layer(x))
    ref = jnp.exp(x)
    assert out.shape == x.shape and out.dtype == x.dtype
    assert jnp.allclose(out, ref, rtol=1e-6, atol=1e-6)

    # 2) Larger activation that exercises the Pallas kernel (lane-divisible,
    #    zero-copy fast path, 2-step parallel grid).
    x2 = jax.random.normal(jax.random.PRNGKey(1), (2, 8, 128, 128), dtype=jnp.float32)
    out2 = jax.block_until_ready(exp_pallas(x2))
    assert jnp.allclose(out2, jnp.exp(x2), rtol=1e-6, atol=1e-6)

    # 3) Ragged (non-multiple-of-128) size, forced through the kernel to cover
    #    the padded / masked-last-block path.
    x3 = jax.random.normal(jax.random.PRNGKey(2), (3, 5, 7, 11), dtype=jnp.float32)
    out3 = jax.block_until_ready(exp_pallas(x3, small_fallback_bytes=0))
    assert out3.shape == x3.shape
    assert jnp.allclose(out3, jnp.exp(x3), rtol=1e-6, atol=1e-6)

    # 4) bf16 input, forced through the kernel to cover the 16-row-granule path.
    x4 = jax.random.normal(jax.random.PRNGKey(3), (2, 4, 128, 128), dtype=jnp.bfloat16)
    out4 = jax.block_until_ready(exp_pallas(x4, small_fallback_bytes=0))
    assert out4.dtype == jnp.bfloat16
    assert jnp.allclose(out4.astype(jnp.float32), jnp.exp(x4.astype(jnp.float32)),
                        rtol=2e-2, atol=2e-2)

    print("KERNEL_OK")
</pallas_src>

<mosaic_0001>
module attributes {stable_mosaic.version = 11 : i64} {
  func.func @_exp_kernel(%arg0: i32, %arg1: memref<1024x128xf32, #tpu.memory_space<vmem>>, %arg2: memref<1024x128xf32, #tpu.memory_space<vmem>>) attributes {dimension_semantics = [#tpu.dimension_semantics<parallel>], iteration_bounds = array<i64: 2>, scalar_prefetch = 0 : i64, scratch_operands = 0 : i64, tpu.core_type = #tpu.core_type<tc>, window_params = [{transform_indices = @transform_0, window_bounds = array<i64: 1024, 128>}, {transform_indices = @transform_1, window_bounds = array<i64: 1024, 128>}]} {
    %c0 = arith.constant 0 : index
    %c0_0 = arith.constant 0 : index
    %0 = vector.load %arg1[%c0, %c0_0] : memref<1024x128xf32, #tpu.memory_space<vmem>>, vector<1024x128xf32>
    %1 = math.exp %0 : vector<1024x128xf32>
    %c0_1 = arith.constant 0 : index
    %c0_2 = arith.constant 0 : index
    %2 = vector.load %arg2[%c0_1, %c0_2] : memref<1024x128xf32, #tpu.memory_space<vmem>>, vector<1024x128xf32>
    tpu.vector_store %arg2[%c0_1, %c0_2], %1 {strides = array<i32>} : memref<1024x128xf32, #tpu.memory_space<vmem>>, vector<1024x128xf32>,
    return
  }
  func.func @transform_0(%arg0: i32) -> (i32, i32) {
    %c0_i32 = arith.constant 0 : i32
    %c0_i32_0 = arith.constant 0 : i32
    return %arg0, %c0_i32 : i32, i32
  }
  func.func @transform_1(%arg0: i32) -> (i32, i32) {
    %c0_i32 = arith.constant 0 : i32
    %c0_i32_0 = arith.constant 0 : i32
    return %arg0, %c0_i32 : i32, i32
  }
}

</mosaic_0001>

<bundles_post_ra>
// kernel: tpu_custom_call.1
= control target key start
LH: loop header
LB: loop body
LE: loop exit
PB: predicated region body
PF: predicated region fallthrough
CT: control target
= control target key end

     0   :  { %6 = vsyncpa [#allocation3], 0  ;;  %s1599_s0 = inlined_call_operand.hbm [shape: f32[2048,128], index: 0, kind: input, shape index: {}]   ;;  %s1600_s1 = inlined_call_operand.hbm [shape: f32[2048,128], index: 1, kind: output, shape index: {}]  }
   0x1   :  { %8 = vsyncpa [#allocation3 + $0x1], 0 }
   0x2   :  { %9 = vsyncpa [#allocation4], 0 }
   0x3   :  { %11 = vsyncpa [#allocation4 + $0x1], 0  ;;  %s1172_s6 = smov 0   ;;  %s1174_s7 = smov 0  }
   0x4   :  { %s1176_s8 = smov 0   ;;  %s1178_s9 = smov 0  }
   0x5 LB: > { %s1193_s10 = sadd.s32 4294967295, %s1154_s9   ;;  %s736_s11 = sadd.s32 4294967294, %s1154_s9   ;;  %s1154_s9 = sphi %s1178_s9, %s1613_s9   ;;  %s1150_s8 = sphi %s1176_s8, %s1612_s8   ;;  %s1146_s7 = sphi %s1174_s7, %s1611_s7   ;;  %s1142_s6 = sphi %s1172_s6, %s1610_s6  }
   0x6   : > { %s1197_s12 = sadd.s32 1, %s1154_s9   ;;  %s24_s13 = sadd.s32 1, %s1150_s8 }
   0x7   : > { %s21_s14 = ssub.s32 %s1154_s9, %s1197_s12  ;;  %p31_p0 = scmp.ne.s32.totalorder %s1150_s8, %s1146_s7 }
   0x8   : > { %p22_p1 = scmp.eq.s32.totalorder %s21_s14, 0  ;;  %p32_p2 = scmp.eq.s32.totalorder %s1154_s9, 0 }
   0x9   : > { %p37_p3 = scmp.ne.s32.totalorder %s1146_s7, %s1142_s6  ;;  %p38_p4 = scmp.eq.s32.totalorder %s1193_s10, 0 }
   0xa   : > { %s1209_s15 = scalar_select %p22_p1, %s1150_s8, %s24_s13  }
   0xb   : > { %p1211_p5 = por %p32_p2, %p31_p0  ;;  %p1215_p6 = por %p38_p4, %p37_p3 }
   0xc   : > { %p61_p7 = scmp.eq.s32.totalorder %s1193_s10, 1  ;;  %p67_p8 = scmp.eq.s32.totalorder %s736_s11, 1 }
   0xd   : > { %p764_p10 = scmp.lt.s32.totalorder %s1154_s9, 2  ;;  %s87_s20 = sand.u32 1, %s1150_s8  }
   0xe   : > { %p1222_p11 = por %p61_p7, %p31_p0  ;;  %p1226_p12 = por %p67_p8, %p37_p3 }
   0xf   : > { %s750_s21 = sshll.u32 %s1154_s9, 14  ;;  %s739_s22 = sshll.u32 %s87_s20, 10 }
  0x10   : > { %s1604_s18 = scalar_select %p1222_p11, 1, 0 }
  0x11   : > { %s1605_s19 = scalar_select %p1226_p12, 1, 0 }
  0x12   : > { %s1235_s25 = scalar_lea.hbm %s1599_s0, %s750_s21  ;;  %s91_s26 = scalar_lea.vmem [#allocation2], %s739_s22 }
  0x13   : > { %s98_s27 = sshll.u32 %s91_s26, 4  ;;  %p1239_p13 = pnand %p764_p10, %p1211_p5  ;;  %s1243_s27 = int_to_ptr.vmem [resolvable:$true] %s98_s27 }
  0x14   : > { %s1245_s29 = scalar_lea.sflag [#allocation3], %s87_s20  ;;  %s1058_s30 = scalar_lea.hbm %s1235_s25, 16384 }
  0x15   : > { %p1059_p0 = scmp.ne.s32.totalorder %s1235_s25, %s1058_s30  ;;  %p1060_p1 = pneg %p1239_p13 }
  0x16   : > { %s1063_s4 = scalar_lea.hbm %s1599_s0, 32768  ;;  %p1064_p4 = scmp.lt.u32.totalorder %s1235_s25, %s1599_s0 }
  0x17   : > { %p1061_p2 = pnand %p1060_p1, %p1059_p0  ;;  %p1065_p5 = scmp.lt.u32.totalorder %s1063_s4, %s1058_s30 }
  0x18   : > { %p1067_p8 = scmp.lt.u32.totalorder %s1058_s30, %s1235_s25 }
  0x19   : > { %p1062_p3 = pneg %p1061_p2  ;;  %p1066_p7 = por %p1065_p5, %p1064_p4 }
  0x1b   : > { %p1068_p10 = por %p1067_p8, %p1066_p7 }
  0x1d   : > { %p1069_p9 = pnand %p1068_p10, %p1062_p3 }
  0x1f   : > { %1072 = shalt.err (!%p1069_p9)
}
  0x20   : > { %s1073_s13 = scalar_lea.vmem %s1243_s27, 16384  ;;  %s1156_s14 = smov [#allocation2]  }
  0x21   : > { %p1074_p0 = scmp.ne.s32.totalorder %s1243_s27, %s1073_s13  ;;  %s1078_s16 = sshll.u32 %s1156_s14, 4  ;;  %s1079_s16 = int_to_ptr.vmem [resolvable:$false] %s1078_s16 }
  0x22   : > { %s1080_s20 = scalar_lea.vmem %s1079_s16, 32768  ;;  %p1081_p11 = scmp.lt.s32.totalorder %s1243_s27, %s1079_s16 }
  0x23   : > { %p1076_p2 = pnand %p1074_p0, %p1060_p1  ;;  %p1082_p4 = scmp.lt.s32.totalorder %s1080_s20, %s1073_s13 }
  0x25   : > { %p1077_p12 = pneg %p1076_p2  ;;  %p1083_p5 = por %p1082_p4, %p1081_p11 }
  0x27   : > { %p1084_p7 = pnand %p1083_p5, %p1077_p12 }
  0x29   : > { %1087 = shalt.err (!%p1084_p7)
}
  0x2a   : > { %s1157_s21 = smov 128   ;;  %s1158_s22 = smov 8  }
  0x2b   : > { %759 = dma.hbm_to_vmem [thread:$0]  (!%p1239_p13), %s1235_s25, 16384, %s1243_s27, %s1245_s29, %s1157_s21, %s1157_s21, %s1158_s22  }
  0x2c   : > { %p742_p9 = scmp.ge.s32.totalorder %s1154_s9, 1  ;;  %p106_p1 = scmp.lt.s32.totalorder %s1154_s9, 3 }
  0x2e   : > { %p107_p3 = pnand %p742_p9, %p106_p1 }
  0x2f   : > { %s1276_s23 = sand.u32 (!%p107_p3), 1, %s1146_s7  }
  0x30   : > { %110 = sbr.rel (%p107_p3) target bundleno = 212 (0xd4), region = 24  ;;  %s743_s24 = sshll.u32 (!%p107_p3), %s1276_s23, 10 }
  0x31   : > { %s113_s26 = scalar_lea.sflag (!%p107_p3), [#allocation3], %s1276_s23  ;;  %s1282_s30 = scalar_lea.vmem (!%p107_p3), [#allocation2], %s743_s24 }
  0x37   : > { %1133 = dma.done.wait (%p1215_p6), %s113_s26, 16384  }
  0x38   : > { %1135 = vsyncadd (%p1215_p6), %s113_s26, 4294950912  ;;  %v137_v0 = vld [vmem:[%s1282_s30] sm:$0xff]  ;;  %v138_v1 = vld [vmem:[%s1282_s30 + $0x8] sm:$0xff]  ;;  %s1308_s17 = scalar_lea.vmem [#allocation5], %s743_s24  ;;  %s751_s25 = sshll.u32 %s1193_s10, 14 }
  0x39   : > { %v139_v2 = vld [vmem:[%s1282_s30 + $0x10] sm:$0xff]  ;;  %v265_v3 = vmul.f32 1.442695, %v137_v0  ;;  %v267_v4 = vmul.f32 1.442695, %v138_v1  ;;  %v140_v6 = vld [vmem:[%s1282_s30 + $0x18] sm:$0xff]  ;;  %s1549_s2 = scalar_lea.hbm %s1600_s1, %s751_s25 }
  0x3a   : > { %v269_v5 = vmul.f32 1.442695, %v139_v2  ;;  %v141_v7 = vld [vmem:[%s1282_s30 + $0x20] sm:$0xff]  ;;  %v142_v8 = vld [vmem:[%s1282_s30 + $0x28] sm:$0xff]  ;;  %v271_v9 = vmul.f32 1.442695, %v140_v6 }
  0x3b   : > { %802 = vpow2.f32 %v265_v3  ;;  %v273_v10 = vmul.f32 1.442695, %v141_v7  ;;  %v275_v11 = vmul.f32 1.442695, %v142_v8  ;;  %v143_v12 = vld [vmem:[%s1282_s30 + $0x30] sm:$0xff]  ;;  %v144_v13 = vld [vmem:[%s1282_s30 + $0x38] sm:$0xff] }
  0x3c   : > { %804 = vpow2.f32 %v267_v4  ;;  %v145_v14 = vld [vmem:[%s1282_s30 + $0x40] sm:$0xff]  ;;  %v277_v15 = vmul.f32 1.442695, %v143_v12  ;;  %v279_v16 = vmul.f32 1.442695, %v144_v13  ;;  %v146_v17 = vld [vmem:[%s1282_s30 + $0x48] sm:$0xff] }
  0x3d   : > { %806 = vpow2.f32 %v269_v5  ;;  %v147_v18 = vld [vmem:[%s1282_s30 + $0x50] sm:$0xff]  ;;  %v281_v19 = vmul.f32 1.442695, %v145_v14  ;;  %v148_v20 = vld [vmem:[%s1282_s30 + $0x58] sm:$0xff]  ;;  %v283_v21 = vmul.f32 1.442695, %v146_v17 }
  0x3e   : > { %808 = vpow2.f32 %v271_v9  ;;  %v149_v22 = vld [vmem:[%s1282_s30 + $0x60] sm:$0xff]  ;;  %v285_v23 = vmul.f32 1.442695, %v147_v18  ;;  %v150_v24 = vld [vmem:[%s1282_s30 + $0x68] sm:$0xff]  ;;  %v287_v25 = vmul.f32 1.442695, %v148_v20 }
  0x3f   : > { %810 = vpow2.f32 %v273_v10  ;;  %v151_v26 = vld [vmem:[%s1282_s30 + $0x70] sm:$0xff]  ;;  %v289_v27 = vmul.f32 1.442695, %v149_v22  ;;  %v152_v28 = vld [vmem:[%s1282_s30 + $0x78] sm:$0xff]  ;;  %v291_v29 = vmul.f32 1.442695, %v150_v24 }
  0x40   : > { %812 = vpow2.f32 %v275_v11  ;;  %v153_v30 = vld [vmem:[%s1282_s30 + $0x80] sm:$0xff]  ;;  %v293_v32 = vmul.f32 1.442695, %v151_v26  ;;  %v154_v33 = vld [vmem:[%s1282_s30 + $0x88] sm:$0xff]  ;;  %v295_v35 = vmul.f32 1.442695, %v152_v28 }
  0x41   : > { %814 = vpow2.f32 %v277_v15  ;;  %v155_v36 = vld [vmem:[%s1282_s30 + $0x90] sm:$0xff]  ;;  %v297_v38 = vmul.f32 1.442695, %v153_v30  ;;  %v156_v39 = vld [vmem:[%s1282_s30 + $0x98] sm:$0xff]  ;;  %v299_v41 = vmul.f32 1.442695, %v154_v33 }
  0x42   : > { %816 = vpow2.f32 %v279_v16  ;;  %v157_v42 = vld [vmem:[%s1282_s30 + $0xa0] sm:$0xff]  ;;  %v301_v44 = vmul.f32 1.442695, %v155_v36  ;;  %v158_v45 = vld [vmem:[%s1282_s30 + $0xa8] sm:$0xff]  ;;  %v303_v47 = vmul.f32 1.442695, %v156_v39 }
  0x43   : > { %818 = vpow2.f32 %v281_v19  ;;  %v159_v48 = vld [vmem:[%s1282_s30 + $0xb0] sm:$0xff]  ;;  %v305_v50 = vmul.f32 1.442695, %v157_v42  ;;  %v160_v51 = vld [vmem:[%s1282_s30 + $0xb8] sm:$0xff]  ;;  %v307_v53 = vmul.f32 1.442695, %v158_v45 }
  0x44   : > { %820 = vpow2.f32 %v283_v21  ;;  %v161_v54 = vld [vmem:[%s1282_s30 + $0xc0] sm:$0xff]  ;;  %v309_v56 = vmul.f32 1.442695, %v159_v48  ;;  %v162_v57 = vld [vmem:[%s1282_s30 + $0xc8] sm:$0xff]  ;;  %v311_v59 = vmul.f32 1.442695, %v160_v51 }
  0x45   : > { %v803_v31 = vpop.eup %802  ;;  %822 = vpow2.f32 %v285_v23  ;;  %v163_v60 = vld [vmem:[%s1282_s30 + $0xd0] sm:$0xff]  ;;  %v313_v62 = vmul.f32 1.442695, %v161_v54  ;;  %v164_v63 = vld [vmem:[%s1282_s30 + $0xd8] sm:$0xff]  ;;  %v315_v1 = vmul.f32 1.442695, %v162_v57 }
  0x46   : > { %v805_v34 = vpop.eup %804  ;;  %521 = vst [vmem:[%s1308_s17] sm:$0xff] %v803_v31  ;;  %824 = vpow2.f32 %v287_v25  ;;  %v165_v2 = vld [vmem:[%s1282_s30 + $0xe0] sm:$0xff]  ;;  %v317_v4 = vmul.f32 1.442695, %v163_v60  ;;  %v166_v5 = vld [vmem:[%s1282_s30 + $0xe8] sm:$0xff]  ;;  %v319_v7 = vmul.f32 1.442695, %v164_v63 }
  0x47   : > { %v807_v37 = vpop.eup %806  ;;  %522 = vst [vmem:[%s1308_s17 + $0x8] sm:$0xff] %v805_v34  ;;  %826 = vpow2.f32 %v289_v27  ;;  %v167_v8 = vld [vmem:[%s1282_s30 + $0xf0] sm:$0xff]  ;;  %v321_v10 = vmul.f32 1.442695, %v165_v2  ;;  %v168_v11 = vld [vmem:[%s1282_s30 + $0xf8] sm:$0xff]  ;;  %v169_v14 = vld [vmem:[%s1282_s30 + $0x100] sm:$0xff] }
  0x48   : > { %v809_v40 = vpop.eup %808  ;;  %523 = vst [vmem:[%s1308_s17 + $0x10] sm:$0xff] %v807_v37  ;;  %828 = vpow2.f32 %v291_v29  ;;  %v323_v13 = vmul.f32 1.442695, %v166_v5  ;;  %v325_v16 = vmul.f32 1.442695, %v167_v8  ;;  %v170_v17 = vld [vmem:[%s1282_s30 + $0x108] sm:$0xff] }
  0x49   : > { %v811_v43 = vpop.eup %810  ;;  %524 = vst [vmem:[%s1308_s17 + $0x18] sm:$0xff] %v809_v40  ;;  %830 = vpow2.f32 %v293_v32  ;;  %v327_v19 = vmul.f32 1.442695, %v168_v11  ;;  %v171_v20 = vld [vmem:[%s1282_s30 + $0x110] sm:$0xff]  ;;  %v329_v22 = vmul.f32 1.442695, %v169_v14 }
  0x4a   : > { %v813_v46 = vpop.eup %812  ;;  %525 = vst [vmem:[%s1308_s17 + $0x20] sm:$0xff] %v811_v43  ;;  %832 = vpow2.f32 %v295_v35  ;;  %v172_v23 = vld [vmem:[%s1282_s30 + $0x118] sm:$0xff]  ;;  %v331_v25 = vmul.f32 1.442695, %v170_v17  ;;  %v173_v26 = vld [vmem:[%s1282_s30 + $0x120] sm:$0xff]  ;;  %v174_v29 = vld [vmem:[%s1282_s30 + $0x128] sm:$0xff] }
  0x4b   : > { %v815_v49 = vpop.eup %814  ;;  %526 = vst [vmem:[%s1308_s17 + $0x28] sm:$0xff] %v813_v46  ;;  %834 = vpow2.f32 %v297_v38  ;;  %v333_v28 = vmul.f32 1.442695, %v171_v20  ;;  %v335_v31 = vmul.f32 1.442695, %v172_v23  ;;  %v175_v32 = vld [vmem:[%s1282_s30 + $0x130] sm:$0xff] }
  0x4c   : > { %v817_v52 = vpop.eup %816  ;;  %527 = vst [vmem:[%s1308_s17 + $0x30] sm:$0xff] %v815_v49  ;;  %836 = vpow2.f32 %v299_v41  ;;  %v337_v34 = vmul.f32 1.442695, %v173_v26  ;;  %v176_v35 = vld [vmem:[%s1282_s30 + $0x138] sm:$0xff]  ;;  %v339_v37 = vmul.f32 1.442695, %v174_v29 }
  0x4d   : > { %v819_v55 = vpop.eup %818  ;;  %528 = vst [vmem:[%s1308_s17 + $0x38] sm:$0xff] %v817_v52  ;;  %838 = vpow2.f32 %v301_v44  ;;  %v177_v38 = vld [vmem:[%s1282_s30 + $0x140] sm:$0xff]  ;;  %v341_v40 = vmul.f32 1.442695, %v175_v32  ;;  %v178_v41 = vld [vmem:[%s1282_s30 + $0x148] sm:$0xff]  ;;  %v179_v44 = vld [vmem:[%s1282_s30 + $0x150] sm:$0xff] }
  0x4e   : > { %v821_v58 = vpop.eup %820  ;;  %529 = vst [vmem:[%s1308_s17 + $0x40] sm:$0xff] %v819_v55  ;;  %840 = vpow2.f32 %v303_v47  ;;  %v343_v43 = vmul.f32 1.442695, %v176_v35  ;;  %v345_v46 = vmul.f32 1.442695, %v177_v38  ;;  %v180_v47 = vld [vmem:[%s1282_s30 + $0x158] sm:$0xff] }
  0x4f   : > { %v823_v61 = vpop.eup %822  ;;  %530 = vst [vmem:[%s1308_s17 + $0x48] sm:$0xff] %v821_v58  ;;  %842 = vpow2.f32 %v305_v50  ;;  %v347_v49 = vmul.f32 1.442695, %v178_v41  ;;  %v181_v50 = vld [vmem:[%s1282_s30 + $0x160] sm:$0xff]  ;;  %v349_v52 = vmul.f32 1.442695, %v179_v44 }
  0x50   : > { %v825_v0 = vpop.eup %824  ;;  %531 = vst [vmem:[%s1308_s17 + $0x50] sm:$0xff] %v823_v61  ;;  %844 = vpow2.f32 %v307_v53  ;;  %v182_v53 = vld [vmem:[%s1282_s30 + $0x168] sm:$0xff]  ;;  %v351_v55 = vmul.f32 1.442695, %v180_v47  ;;  %v353_v58 = vmul.f32 1.442695, %v181_v50 }
  0x51   : > { %v827_v3 = vpop.eup %826  ;;  %532 = vst [vmem:[%s1308_s17 + $0x58] sm:$0xff] %v825_v0  ;;  %846 = vpow2.f32 %v309_v56  ;;  %v183_v56 = vld [vmem:[%s1282_s30 + $0x170] sm:$0xff]  ;;  %v355_v61 = vmul.f32 1.442695, %v182_v53  ;;  %s663_s27 = sshll.u32 %s1308_s17, 4  ;;  %s650_s10 = scalar_lea.sflag [#allocation4], %s1276_s23  ;;  %s1552_s27 = int_to_ptr.vmem [resolvable:$true] %s663_s27 }
  0x52   : > { %v829_v6 = vpop.eup %828  ;;  %533 = vst [vmem:[%s1308_s17 + $0x60] sm:$0xff] %v827_v3  ;;  %848 = vpow2.f32 %v311_v59  ;;  %v184_v59 = vld [vmem:[%s1282_s30 + $0x178] sm:$0xff]  ;;  %v357_v0 = vmul.f32 1.442695, %v183_v56  ;;  %s1088_s3 = scalar_lea.vmem %s1552_s27, 16384  ;;  %p1607_p11 = scmp.ne.s32.totalorder %s1604_s18, 0 }
  0x53   : > { %v831_v9 = vpop.eup %830  ;;  %534 = vst [vmem:[%s1308_s17 + $0x68] sm:$0xff] %v829_v6  ;;  %850 = vpow2.f32 %v313_v62  ;;  %v185_v62 = vld [vmem:[%s1282_s30 + $0x180] sm:$0xff]  ;;  %v359_v3 = vmul.f32 1.442695, %v184_v59  ;;  %p1089_p6 = scmp.ne.s32.totalorder %s1552_s27, %s1088_s3  ;;  %s1159_s4 = smov [#allocation5]  }
  0x54   : > { %v833_v12 = vpop.eup %832  ;;  %535 = vst [vmem:[%s1308_s17 + $0x70] sm:$0xff] %v831_v9  ;;  %852 = vpow2.f32 %v315_v1  ;;  %v186_v1 = vld [vmem:[%s1282_s30 + $0x188] sm:$0xff]  ;;  %v361_v6 = vmul.f32 1.442695, %v185_v62  ;;  %s1092_s5 = sshll.u32 %s1159_s4, 4  ;;  %s1093_s5 = int_to_ptr.vmem [resolvable:$false] %s1092_s5 }
  0x55   : > { %v835_v15 = vpop.eup %834  ;;  %536 = vst [vmem:[%s1308_s17 + $0x78] sm:$0xff] %v833_v12  ;;  %854 = vpow2.f32 %v317_v4  ;;  %v187_v4 = vld [vmem:[%s1282_s30 + $0x190] sm:$0xff]  ;;  %v363_v9 = vmul.f32 1.442695, %v186_v1  ;;  %p1090_p12 = pnand %p1089_p6, %p1607_p11  ;;  %s1094_s11 = scalar_lea.vmem %s1093_s5, 32768 }
  0x56   : > { %v837_v18 = vpop.eup %836  ;;  %537 = vst [vmem:[%s1308_s17 + $0x80] sm:$0xff] %v835_v15  ;;  %856 = vpow2.f32 %v319_v7  ;;  %v188_v7 = vld [vmem:[%s1282_s30 + $0x198] sm:$0xff]  ;;  %v365_v12 = vmul.f32 1.442695, %v187_v4  ;;  %p1095_p8 = scmp.lt.s32.totalorder %s1552_s27, %s1093_s5  ;;  %p1096_p10 = scmp.lt.s32.totalorder %s1094_s11, %s1088_s3 }
  0x57   : > { %v839_v21 = vpop.eup %838  ;;  %538 = vst [vmem:[%s1308_s17 + $0x88] sm:$0xff] %v837_v18  ;;  %858 = vpow2.f32 %v321_v10  ;;  %v189_v10 = vld [vmem:[%s1282_s30 + $0x1a0] sm:$0xff]  ;;  %v367_v15 = vmul.f32 1.442695, %v188_v7  ;;  %p1091_p13 = pneg %p1090_p12 }
  0x58   : > { %v841_v24 = vpop.eup %840  ;;  %539 = vst [vmem:[%s1308_s17 + $0x90] sm:$0xff] %v839_v21  ;;  %860 = vpow2.f32 %v323_v13  ;;  %v190_v13 = vld [vmem:[%s1282_s30 + $0x1a8] sm:$0xff]  ;;  %v369_v18 = vmul.f32 1.442695, %v189_v10  ;;  %p1097_p0 = por %p1096_p10, %p1095_p8 }
  0x59   : > { %v843_v27 = vpop.eup %842  ;;  %540 = vst [vmem:[%s1308_s17 + $0x98] sm:$0xff] %v841_v24  ;;  %862 = vpow2.f32 %v325_v16  ;;  %v191_v16 = vld [vmem:[%s1282_s30 + $0x1b0] sm:$0xff]  ;;  %v371_v21 = vmul.f32 1.442695, %v190_v13 }
  0x5a   : > { %v845_v30 = vpop.eup %844  ;;  %541 = vst [vmem:[%s1308_s17 + $0xa0] sm:$0xff] %v843_v27  ;;  %864 = vpow2.f32 %v327_v19  ;;  %v192_v19 = vld [vmem:[%s1282_s30 + $0x1b8] sm:$0xff]  ;;  %v373_v24 = vmul.f32 1.442695, %v191_v16  ;;  %p1098_p2 = pnand %p1097_p0, %p1091_p13 }
  0x5b   : > { %v847_v33 = vpop.eup %846  ;;  %542 = vst [vmem:[%s1308_s17 + $0xa8] sm:$0xff] %v845_v30  ;;  %866 = vpow2.f32 %v329_v22  ;;  %v193_v22 = vld [vmem:[%s1282_s30 + $0x1c0] sm:$0xff]  ;;  %v375_v27 = vmul.f32 1.442695, %v192_v19 }
  0x5c   : > { %v849_v36 = vpop.eup %848  ;;  %543 = vst [vmem:[%s1308_s17 + $0xb0] sm:$0xff] %v847_v33  ;;  %868 = vpow2.f32 %v331_v25  ;;  %v194_v25 = vld [vmem:[%s1282_s30 + $0x1c8] sm:$0xff]  ;;  %v377_v30 = vmul.f32 1.442695, %v193_v22 }
  0x5d   : > { %v851_v39 = vpop.eup %850  ;;  %544 = vst [vmem:[%s1308_s17 + $0xb8] sm:$0xff] %v849_v36  ;;  %870 = vpow2.f32 %v333_v28  ;;  %v195_v28 = vld [vmem:[%s1282_s30 + $0x1d0] sm:$0xff]  ;;  %v379_v33 = vmul.f32 1.442695, %v194_v25 }
  0x5e   : > { %v853_v42 = vpop.eup %852  ;;  %545 = vst [vmem:[%s1308_s17 + $0xc0] sm:$0xff] %v851_v39  ;;  %872 = vpow2.f32 %v335_v31  ;;  %v196_v31 = vld [vmem:[%s1282_s30 + $0x1d8] sm:$0xff]  ;;  %v381_v36 = vmul.f32 1.442695, %v195_v28 }
  0x5f   : > { %v855_v45 = vpop.eup %854  ;;  %546 = vst [vmem:[%s1308_s17 + $0xc8] sm:$0xff] %v853_v42  ;;  %874 = vpow2.f32 %v337_v34  ;;  %v197_v34 = vld [vmem:[%s1282_s30 + $0x1e0] sm:$0xff]  ;;  %v383_v39 = vmul.f32 1.442695, %v196_v31 }
  0x60   : > { %v857_v48 = vpop.eup %856  ;;  %547 = vst [vmem:[%s1308_s17 + $0xd0] sm:$0xff] %v855_v45  ;;  %876 = vpow2.f32 %v339_v37  ;;  %v198_v37 = vld [vmem:[%s1282_s30 + $0x1e8] sm:$0xff]  ;;  %v385_v42 = vmul.f32 1.442695, %v197_v34 }
  0x61   : > { %v859_v51 = vpop.eup %858  ;;  %548 = vst [vmem:[%s1308_s17 + $0xd8] sm:$0xff] %v857_v48  ;;  %878 = vpow2.f32 %v341_v40  ;;  %v199_v40 = vld [vmem:[%s1282_s30 + $0x1f0] sm:$0xff]  ;;  %v387_v45 = vmul.f32 1.442695, %v198_v37 }
  0x62   : > { %v861_v54 = vpop.eup %860  ;;  %549 = vst [vmem:[%s1308_s17 + $0xe0] sm:$0xff] %v859_v51  ;;  %880 = vpow2.f32 %v343_v43  ;;  %v200_v43 = vld [vmem:[%s1282_s30 + $0x1f8] sm:$0xff]  ;;  %v389_v48 = vmul.f32 1.442695, %v199_v40 }
  0x63   : > { %v863_v57 = vpop.eup %862  ;;  %550 = vst [vmem:[%s1308_s17 + $0xe8] sm:$0xff] %v861_v54  ;;  %882 = vpow2.f32 %v345_v46  ;;  %v201_v46 = vld [vmem:[%s1282_s30 + $0x200] sm:$0xff]  ;;  %v391_v51 = vmul.f32 1.442695, %v200_v43 }
  0x64   : > { %v865_v60 = vpop.eup %864  ;;  %551 = vst [vmem:[%s1308_s17 + $0xf0] sm:$0xff] %v863_v57  ;;  %884 = vpow2.f32 %v347_v49  ;;  %v202_v49 = vld [vmem:[%s1282_s30 + $0x208] sm:$0xff]  ;;  %v393_v54 = vmul.f32 1.442695, %v201_v46 }
  0x65   : > { %v867_v63 = vpop.eup %866  ;;  %552 = vst [vmem:[%s1308_s17 + $0xf8] sm:$0xff] %v865_v60  ;;  %886 = vpow2.f32 %v349_v52  ;;  %v203_v52 = vld [vmem:[%s1282_s30 + $0x210] sm:$0xff]  ;;  %v395_v57 = vmul.f32 1.442695, %v202_v49 }
  0x66   : > { %v869_v2 = vpop.eup %868  ;;  %553 = vst [vmem:[%s1308_s17 + $0x100] sm:$0xff] %v867_v63  ;;  %888 = vpow2.f32 %v351_v55  ;;  %v204_v55 = vld [vmem:[%s1282_s30 + $0x218] sm:$0xff]  ;;  %v397_v60 = vmul.f32 1.442695, %v203_v52 }
  0x67   : > { %v871_v5 = vpop.eup %870  ;;  %554 = vst [vmem:[%s1308_s17 + $0x108] sm:$0xff] %v869_v2  ;;  %890 = vpow2.f32 %v353_v58  ;;  %v205_v58 = vld [vmem:[%s1282_s30 + $0x220] sm:$0xff]  ;;  %v399_v63 = vmul.f32 1.442695, %v204_v55 }
  0x68   : > { %v873_v8 = vpop.eup %872  ;;  %555 = vst [vmem:[%s1308_s17 + $0x110] sm:$0xff] %v871_v5  ;;  %892 = vpow2.f32 %v355_v61  ;;  %v206_v61 = vld [vmem:[%s1282_s30 + $0x228] sm:$0xff]  ;;  %v401_v2 = vmul.f32 1.442695, %v205_v58 }
  0x69   : > { %v875_v11 = vpop.eup %874  ;;  %556 = vst [vmem:[%s1308_s17 + $0x118] sm:$0xff] %v873_v8  ;;  %894 = vpow2.f32 %v357_v0  ;;  %v207_v0 = vld [vmem:[%s1282_s30 + $0x230] sm:$0xff]  ;;  %v403_v5 = vmul.f32 1.442695, %v206_v61 }
  0x6a   : > { %v877_v14 = vpop.eup %876  ;;  %557 = vst [vmem:[%s1308_s17 + $0x120] sm:$0xff] %v875_v11  ;;  %896 = vpow2.f32 %v359_v3  ;;  %v208_v3 = vld [vmem:[%s1282_s30 + $0x238] sm:$0xff]  ;;  %v405_v8 = vmul.f32 1.442695, %v207_v0 }
  0x6b   : > { %v879_v17 = vpop.eup %878  ;;  %558 = vst [vmem:[%s1308_s17 + $0x128] sm:$0xff] %v877_v14  ;;  %898 = vpow2.f32 %v361_v6  ;;  %v209_v6 = vld [vmem:[%s1282_s30 + $0x240] sm:$0xff]  ;;  %v407_v11 = vmul.f32 1.442695, %v208_v3 }
  0x6c   : > { %v881_v20 = vpop.eup %880  ;;  %559 = vst [vmem:[%s1308_s17 + $0x130] sm:$0xff] %v879_v17  ;;  %900 = vpow2.f32 %v363_v9  ;;  %v210_v9 = vld [vmem:[%s1282_s30 + $0x248] sm:$0xff]  ;;  %v409_v14 = vmul.f32 1.442695, %v209_v6 }
  0x6d   : > { %v883_v23 = vpop.eup %882  ;;  %560 = vst [vmem:[%s1308_s17 + $0x138] sm:$0xff] %v881_v20  ;;  %902 = vpow2.f32 %v365_v12  ;;  %v211_v12 = vld [vmem:[%s1282_s30 + $0x250] sm:$0xff]  ;;  %v411_v17 = vmul.f32 1.442695, %v210_v9 }
  0x6e   : > { %v885_v26 = vpop.eup %884  ;;  %561 = vst [vmem:[%s1308_s17 + $0x140] sm:$0xff] %v883_v23  ;;  %904 = vpow2.f32 %v367_v15  ;;  %v212_v15 = vld [vmem:[%s1282_s30 + $0x258] sm:$0xff]  ;;  %v413_v20 = vmul.f32 1.442695, %v211_v12 }
  0x6f   : > { %v887_v29 = vpop.eup %886  ;;  %562 = vst [vmem:[%s1308_s17 + $0x148] sm:$0xff] %v885_v26  ;;  %906 = vpow2.f32 %v369_v18  ;;  %v213_v18 = vld [vmem:[%s1282_s30 + $0x260] sm:$0xff]  ;;  %v415_v23 = vmul.f32 1.442695, %v212_v15 }
  0x70   : > { %v889_v32 = vpop.eup %888  ;;  %563 = vst [vmem:[%s1308_s17 + $0x150] sm:$0xff] %v887_v29  ;;  %908 = vpow2.f32 %v371_v21  ;;  %v214_v21 = vld [vmem:[%s1282_s30 + $0x268] sm:$0xff]  ;;  %v417_v26 = vmul.f32 1.442695, %v213_v18 }
  0x71   : > { %v891_v35 = vpop.eup %890  ;;  %564 = vst [vmem:[%s1308_s17 + $0x158] sm:$0xff] %v889_v32  ;;  %910 = vpow2.f32 %v373_v24  ;;  %v215_v24 = vld [vmem:[%s1282_s30 + $0x270] sm:$0xff]  ;;  %v419_v29 = vmul.f32 1.442695, %v214_v21 }
  0x72   : > { %v893_v38 = vpop.eup %892  ;;  %565 = vst [vmem:[%s1308_s17 + $0x160] sm:$0xff] %v891_v35  ;;  %912 = vpow2.f32 %v375_v27  ;;  %v216_v27 = vld [vmem:[%s1282_s30 + $0x278] sm:$0xff]  ;;  %v421_v32 = vmul.f32 1.442695, %v215_v24 }
  0x73   : > { %v895_v41 = vpop.eup %894  ;;  %566 = vst [vmem:[%s1308_s17 + $0x168] sm:$0xff] %v893_v38  ;;  %914 = vpow2.f32 %v377_v30  ;;  %v217_v30 = vld [vmem:[%s1282_s30 + $0x280] sm:$0xff]  ;;  %v423_v35 = vmul.f32 1.442695, %v216_v27 }
  0x74   : > { %v897_v44 = vpop.eup %896  ;;  %567 = vst [vmem:[%s1308_s17 + $0x170] sm:$0xff] %v895_v41  ;;  %916 = vpow2.f32 %v379_v33  ;;  %v218_v33 = vld [vmem:[%s1282_s30 + $0x288] sm:$0xff]  ;;  %v425_v38 = vmul.f32 1.442695, %v217_v30 }
  0x75   : > { %v899_v47 = vpop.eup %898  ;;  %568 = vst [vmem:[%s1308_s17 + $0x178] sm:$0xff] %v897_v44  ;;  %918 = vpow2.f32 %v381_v36  ;;  %v219_v36 = vld [vmem:[%s1282_s30 + $0x290] sm:$0xff]  ;;  %v427_v41 = vmul.f32 1.442695, %v218_v33 }
  0x76   : > { %v901_v50 = vpop.eup %900  ;;  %569 = vst [vmem:[%s1308_s17 + $0x180] sm:$0xff] %v899_v47  ;;  %920 = vpow2.f32 %v383_v39  ;;  %v220_v39 = vld [vmem:[%s1282_s30 + $0x298] sm:$0xff]  ;;  %v429_v44 = vmul.f32 1.442695, %v219_v36 }
  0x77   : > { %v903_v53 = vpop.eup %902  ;;  %570 = vst [vmem:[%s1308_s17 + $0x188] sm:$0xff] %v901_v50  ;;  %922 = vpow2.f32 %v385_v42  ;;  %v221_v42 = vld [vmem:[%s1282_s30 + $0x2a0] sm:$0xff]  ;;  %v431_v47 = vmul.f32 1.442695, %v220_v39 }
  0x78   : > { %v905_v56 = vpop.eup %904  ;;  %571 = vst [vmem:[%s1308_s17 + $0x190] sm:$0xff] %v903_v53  ;;  %924 = vpow2.f32 %v387_v45  ;;  %v222_v45 = vld [vmem:[%s1282_s30 + $0x2a8] sm:$0xff]  ;;  %v433_v50 = vmul.f32 1.442695, %v221_v42 }
  0x79   : > { %v907_v59 = vpop.eup %906  ;;  %572 = vst [vmem:[%s1308_s17 + $0x198] sm:$0xff] %v905_v56  ;;  %926 = vpow2.f32 %v389_v48  ;;  %v223_v48 = vld [vmem:[%s1282_s30 + $0x2b0] sm:$0xff]  ;;  %v435_v53 = vmul.f32 1.442695, %v222_v45 }
  0x7a   : > { %v909_v62 = vpop.eup %908  ;;  %573 = vst [vmem:[%s1308_s17 + $0x1a0] sm:$0xff] %v907_v59  ;;  %928 = vpow2.f32 %v391_v51  ;;  %v224_v51 = vld [vmem:[%s1282_s30 + $0x2b8] sm:$0xff]  ;;  %v437_v56 = vmul.f32 1.442695, %v223_v48 }
  0x7b   : > { %v911_v1 = vpop.eup %910  ;;  %574 = vst [vmem:[%s1308_s17 + $0x1a8] sm:$0xff] %v909_v62  ;;  %930 = vpow2.f32 %v393_v54  ;;  %v225_v54 = vld [vmem:[%s1282_s30 + $0x2c0] sm:$0xff]  ;;  %v439_v59 = vmul.f32 1.442695, %v224_v51 }
  0x7c   : > { %v913_v4 = vpop.eup %912  ;;  %575 = vst [vmem:[%s1308_s17 + $0x1b0] sm:$0xff] %v911_v1  ;;  %932 = vpow2.f32 %v395_v57  ;;  %v226_v57 = vld [vmem:[%s1282_s30 + $0x2c8] sm:$0xff]  ;;  %v441_v62 = vmul.f32 1.442695, %v225_v54 }
  0x7d   : > { %v915_v7 = vpop.eup %914  ;;  %576 = vst [vmem:[%s1308_s17 + $0x1b8] sm:$0xff] %v913_v4  ;;  %934 = vpow2.f32 %v397_v60  ;;  %v227_v60 = vld [vmem:[%s1282_s30 + $0x2d0] sm:$0xff]  ;;  %v443_v1 = vmul.f32 1.442695, %v226_v57 }
  0x7e   : > { %v917_v10 = vpop.eup %916  ;;  %577 = vst [vmem:[%s1308_s17 + $0x1c0] sm:$0xff] %v915_v7  ;;  %936 = vpow2.f32 %v399_v63  ;;  %v228_v63 = vld [vmem:[%s1282_s30 + $0x2d8] sm:$0xff]  ;;  %v445_v4 = vmul.f32 1.442695, %v227_v60 }
  0x7f   : > { %v919_v13 = vpop.eup %918  ;;  %578 = vst [vmem:[%s1308_s17 + $0x1c8] sm:$0xff] %v917_v10  ;;  %938 = vpow2.f32 %v401_v2  ;;  %v229_v2 = vld [vmem:[%s1282_s30 + $0x2e0] sm:$0xff]  ;;  %v447_v7 = vmul.f32 1.442695, %v228_v63 }
  0x80   : > { %v921_v16 = vpop.eup %920  ;;  %579 = vst [vmem:[%s1308_s17 + $0x1d0] sm:$0xff] %v919_v13  ;;  %940 = vpow2.f32 %v403_v5  ;;  %v230_v5 = vld [vmem:[%s1282_s30 + $0x2e8] sm:$0xff]  ;;  %v449_v10 = vmul.f32 1.442695, %v229_v2 }
  0x81   : > { %v923_v19 = vpop.eup %922  ;;  %580 = vst [vmem:[%s1308_s17 + $0x1d8] sm:$0xff] %v921_v16  ;;  %942 = vpow2.f32 %v405_v8  ;;  %v231_v8 = vld [vmem:[%s1282_s30 + $0x2f0] sm:$0xff]  ;;  %v451_v13 = vmul.f32 1.442695, %v230_v5 }
  0x82   : > { %v925_v22 = vpop.eup %924  ;;  %581 = vst [vmem:[%s1308_s17 + $0x1e0] sm:$0xff] %v923_v19  ;;  %944 = vpow2.f32 %v407_v11  ;;  %v232_v11 = vld [vmem:[%s1282_s30 + $0x2f8] sm:$0xff]  ;;  %v453_v16 = vmul.f32 1.442695, %v231_v8 }
  0x83   : > { %v927_v25 = vpop.eup %926  ;;  %582 = vst [vmem:[%s1308_s17 + $0x1e8] sm:$0xff] %v925_v22  ;;  %946 = vpow2.f32 %v409_v14  ;;  %v233_v14 = vld [vmem:[%s1282_s30 + $0x300] sm:$0xff]  ;;  %v455_v19 = vmul.f32 1.442695, %v232_v11 }
  0x84   : > { %v929_v28 = vpop.eup %928  ;;  %583 = vst [vmem:[%s1308_s17 + $0x1f0] sm:$0xff] %v927_v25  ;;  %948 = vpow2.f32 %v411_v17  ;;  %v234_v17 = vld [vmem:[%s1282_s30 + $0x308] sm:$0xff]  ;;  %v457_v22 = vmul.f32 1.442695, %v233_v14 }
  0x85   : > { %v931_v31 = vpop.eup %930  ;;  %584 = vst [vmem:[%s1308_s17 + $0x1f8] sm:$0xff] %v929_v28  ;;  %950 = vpow2.f32 %v413_v20  ;;  %v235_v20 = vld [vmem:[%s1282_s30 + $0x310] sm:$0xff]  ;;  %v459_v25 = vmul.f32 1.442695, %v234_v17 }
  0x86   : > { %v933_v34 = vpop.eup %932  ;;  %585 = vst [vmem:[%s1308_s17 + $0x200] sm:$0xff] %v931_v31  ;;  %952 = vpow2.f32 %v415_v23  ;;  %v236_v23 = vld [vmem:[%s1282_s30 + $0x318] sm:$0xff]  ;;  %v461_v28 = vmul.f32 1.442695, %v235_v20 }
  0x87   : > { %v935_v37 = vpop.eup %934  ;;  %586 = vst [vmem:[%s1308_s17 + $0x208] sm:$0xff] %v933_v34  ;;  %954 = vpow2.f32 %v417_v26  ;;  %v237_v26 = vld [vmem:[%s1282_s30 + $0x320] sm:$0xff]  ;;  %v463_v31 = vmul.f32 1.442695, %v236_v23 }
  0x88   : > { %v937_v40 = vpop.eup %936  ;;  %587 = vst [vmem:[%s1308_s17 + $0x210] sm:$0xff] %v935_v37  ;;  %956 = vpow2.f32 %v419_v29  ;;  %v238_v29 = vld [vmem:[%s1282_s30 + $0x328] sm:$0xff]  ;;  %v465_v34 = vmul.f32 1.442695, %v237_v26 }
  0x89   : > { %v939_v43 = vpop.eup %938  ;;  %588 = vst [vmem:[%s1308_s17 + $0x218] sm:$0xff] %v937_v40  ;;  %958 = vpow2.f32 %v421_v32  ;;  %v239_v32 = vld [vmem:[%s1282_s30 + $0x330] sm:$0xff]  ;;  %v467_v37 = vmul.f32 1.442695, %v238_v29 }
  0x8a   : > { %v941_v46 = vpop.eup %940  ;;  %589 = vst [vmem:[%s1308_s17 + $0x220] sm:$0xff] %v939_v43  ;;  %960 = vpow2.f32 %v423_v35  ;;  %v240_v35 = vld [vmem:[%s1282_s30 + $0x338] sm:$0xff]  ;;  %v469_v40 = vmul.f32 1.442695, %v239_v32 }
  0x8b   : > { %v943_v49 = vpop.eup %942  ;;  %590 = vst [vmem:[%s1308_s17 + $0x228] sm:$0xff] %v941_v46  ;;  %962 = vpow2.f32 %v425_v38  ;;  %v241_v38 = vld [vmem:[%s1282_s30 + $0x340] sm:$0xff]  ;;  %v471_v43 = vmul.f32 1.442695, %v240_v35 }
  0x8c   : > { %v945_v52 = vpop.eup %944  ;;  %591 = vst [vmem:[%s1308_s17 + $0x230] sm:$0xff] %v943_v49  ;;  %964 = vpow2.f32 %v427_v41  ;;  %v242_v41 = vld [vmem:[%s1282_s30 + $0x348] sm:$0xff]  ;;  %v473_v46 = vmul.f32 1.442695, %v241_v38 }
  0x8d   : > { %v947_v55 = vpop.eup %946  ;;  %592 = vst [vmem:[%s1308_s17 + $0x238] sm:$0xff] %v945_v52  ;;  %966 = vpow2.f32 %v429_v44  ;;  %v243_v44 = vld [vmem:[%s1282_s30 + $0x350] sm:$0xff]  ;;  %v475_v49 = vmul.f32 1.442695, %v242_v41 }
  0x8e   : > { %v949_v58 = vpop.eup %948  ;;  %593 = vst [vmem:[%s1308_s17 + $0x240] sm:$0xff] %v947_v55  ;;  %968 = vpow2.f32 %v431_v47  ;;  %v244_v47 = vld [vmem:[%s1282_s30 + $0x358] sm:$0xff]  ;;  %v477_v52 = vmul.f32 1.442695, %v243_v44 }
  0x8f   : > { %v951_v61 = vpop.eup %950  ;;  %594 = vst [vmem:[%s1308_s17 + $0x248] sm:$0xff] %v949_v58  ;;  %970 = vpow2.f32 %v433_v50  ;;  %v245_v50 = vld [vmem:[%s1282_s30 + $0x360] sm:$0xff]  ;;  %v479_v55 = vmul.f32 1.442695, %v244_v47 }
  0x90   : > { %v953_v0 = vpop.eup %952  ;;  %595 = vst [vmem:[%s1308_s17 + $0x250] sm:$0xff] %v951_v61  ;;  %972 = vpow2.f32 %v435_v53  ;;  %v246_v53 = vld [vmem:[%s1282_s30 + $0x368] sm:$0xff]  ;;  %v481_v58 = vmul.f32 1.442695, %v245_v50 }
  0x91   : > { %v955_v3 = vpop.eup %954  ;;  %596 = vst [vmem:[%s1308_s17 + $0x258] sm:$0xff] %v953_v0  ;;  %974 = vpow2.f32 %v437_v56  ;;  %v247_v56 = vld [vmem:[%s1282_s30 + $0x370] sm:$0xff]  ;;  %v483_v61 = vmul.f32 1.442695, %v246_v53 }
  0x92   : > { %v957_v6 = vpop.eup %956  ;;  %597 = vst [vmem:[%s1308_s17 + $0x260] sm:$0xff] %v955_v3  ;;  %976 = vpow2.f32 %v439_v59  ;;  %v248_v59 = vld [vmem:[%s1282_s30 + $0x378] sm:$0xff]  ;;  %v485_v0 = vmul.f32 1.442695, %v247_v56 }
  0x93   : > { %v959_v9 = vpop.eup %958  ;;  %598 = vst [vmem:[%s1308_s17 + $0x268] sm:$0xff] %v957_v6  ;;  %978 = vpow2.f32 %v441_v62  ;;  %v249_v62 = vld [vmem:[%s1282_s30 + $0x380] sm:$0xff]  ;;  %v487_v3 = vmul.f32 1.442695, %v248_v59 }
  0x94   : > { %v961_v12 = vpop.eup %960  ;;  %599 = vst [vmem:[%s1308_s17 + $0x270] sm:$0xff] %v959_v9  ;;  %980 = vpow2.f32 %v443_v1  ;;  %v250_v1 = vld [vmem:[%s1282_s30 + $0x388] sm:$0xff]  ;;  %v489_v6 = vmul.f32 1.442695, %v249_v62 }
  0x95   : > { %v963_v15 = vpop.eup %962  ;;  %600 = vst [vmem:[%s1308_s17 + $0x278] sm:$0xff] %v961_v12  ;;  %982 = vpow2.f32 %v445_v4  ;;  %v251_v4 = vld [vmem:[%s1282_s30 + $0x390] sm:$0xff]  ;;  %v491_v9 = vmul.f32 1.442695, %v250_v1 }
  0x96   : > { %v965_v18 = vpop.eup %964  ;;  %601 = vst [vmem:[%s1308_s17 + $0x280] sm:$0xff] %v963_v15  ;;  %984 = vpow2.f32 %v447_v7  ;;  %v252_v7 = vld [vmem:[%s1282_s30 + $0x398] sm:$0xff]  ;;  %v493_v12 = vmul.f32 1.442695, %v251_v4 }
  0x97   : > { %v967_v21 = vpop.eup %966  ;;  %602 = vst [vmem:[%s1308_s17 + $0x288] sm:$0xff] %v965_v18  ;;  %986 = vpow2.f32 %v449_v10  ;;  %v253_v10 = vld [vmem:[%s1282_s30 + $0x3a0] sm:$0xff]  ;;  %v495_v15 = vmul.f32 1.442695, %v252_v7 }
  0x98   : > { %v969_v24 = vpop.eup %968  ;;  %603 = vst [vmem:[%s1308_s17 + $0x290] sm:$0xff] %v967_v21  ;;  %988 = vpow2.f32 %v451_v13  ;;  %v254_v13 = vld [vmem:[%s1282_s30 + $0x3a8] sm:$0xff]  ;;  %v497_v18 = vmul.f32 1.442695, %v253_v10 }
  0x99   : > { %v971_v27 = vpop.eup %970  ;;  %604 = vst [vmem:[%s1308_s17 + $0x298] sm:$0xff] %v969_v24  ;;  %990 = vpow2.f32 %v453_v16  ;;  %v255_v16 = vld [vmem:[%s1282_s30 + $0x3b0] sm:$0xff]  ;;  %v499_v21 = vmul.f32 1.442695, %v254_v13 }
  0x9a   : > { %v973_v30 = vpop.eup %972  ;;  %605 = vst [vmem:[%s1308_s17 + $0x2a0] sm:$0xff] %v971_v27  ;;  %992 = vpow2.f32 %v455_v19  ;;  %v256_v19 = vld [vmem:[%s1282_s30 + $0x3b8] sm:$0xff]  ;;  %v501_v24 = vmul.f32 1.442695, %v255_v16 }
  0x9b   : > { %v975_v33 = vpop.eup %974  ;;  %606 = vst [vmem:[%s1308_s17 + $0x2a8] sm:$0xff] %v973_v30  ;;  %994 = vpow2.f32 %v457_v22  ;;  %v257_v22 = vld [vmem:[%s1282_s30 + $0x3c0] sm:$0xff]  ;;  %v503_v27 = vmul.f32 1.442695, %v256_v19 }
  0x9c   : > { %v977_v36 = vpop.eup %976  ;;  %607 = vst [vmem:[%s1308_s17 + $0x2b0] sm:$0xff] %v975_v33  ;;  %996 = vpow2.f32 %v459_v25  ;;  %v258_v25 = vld [vmem:[%s1282_s30 + $0x3c8] sm:$0xff]  ;;  %v505_v30 = vmul.f32 1.442695, %v257_v22 }
  0x9d   : > { %v979_v39 = vpop.eup %978  ;;  %608 = vst [vmem:[%s1308_s17 + $0x2b8] sm:$0xff] %v977_v36  ;;  %998 = vpow2.f32 %v461_v28  ;;  %v259_v28 = vld [vmem:[%s1282_s30 + $0x3d0] sm:$0xff]  ;;  %v507_v33 = vmul.f32 1.442695, %v258_v25 }
  0x9e   : > { %v981_v42 = vpop.eup %980  ;;  %609 = vst [vmem:[%s1308_s17 + $0x2c0] sm:$0xff] %v979_v39  ;;  %1000 = vpow2.f32 %v463_v31  ;;  %v260_v31 = vld [vmem:[%s1282_s30 + $0x3d8] sm:$0xff]  ;;  %v509_v36 = vmul.f32 1.442695, %v259_v28 }
  0x9f   : > { %v983_v45 = vpop.eup %982  ;;  %610 = vst [vmem:[%s1308_s17 + $0x2c8] sm:$0xff] %v981_v42  ;;  %1002 = vpow2.f32 %v465_v34  ;;  %v261_v34 = vld [vmem:[%s1282_s30 + $0x3e0] sm:$0xff]  ;;  %v511_v39 = vmul.f32 1.442695, %v260_v31 }
  0xa0   : > { %v985_v48 = vpop.eup %984  ;;  %611 = vst [vmem:[%s1308_s17 + $0x2d0] sm:$0xff] %v983_v45  ;;  %1004 = vpow2.f32 %v467_v37  ;;  %v262_v37 = vld [vmem:[%s1282_s30 + $0x3e8] sm:$0xff]  ;;  %v513_v42 = vmul.f32 1.442695, %v261_v34 }
  0xa1   : > { %v987_v51 = vpop.eup %986  ;;  %612 = vst [vmem:[%s1308_s17 + $0x2d8] sm:$0xff] %v985_v48  ;;  %1006 = vpow2.f32 %v469_v40  ;;  %v263_v40 = vld [vmem:[%s1282_s30 + $0x3f0] sm:$0xff]  ;;  %v515_v45 = vmul.f32 1.442695, %v262_v37 }
  0xa2   : > { %v989_v54 = vpop.eup %988  ;;  %613 = vst [vmem:[%s1308_s17 + $0x2e0] sm:$0xff] %v987_v51  ;;  %1008 = vpow2.f32 %v471_v43  ;;  %v264_v43 = vld [vmem:[%s1282_s30 + $0x3f8] sm:$0xff]  ;;  %v517_v47 = vmul.f32 1.442695, %v263_v40 }
  0xa3   : > { %v991_v57 = vpop.eup %990  ;;  %614 = vst [vmem:[%s1308_s17 + $0x2e8] sm:$0xff] %v989_v54  ;;  %1010 = vpow2.f32 %v473_v46 }
  0xa4   : > { %v993_v60 = vpop.eup %992  ;;  %615 = vst [vmem:[%s1308_s17 + $0x2f0] sm:$0xff] %v991_v57  ;;  %1012 = vpow2.f32 %v475_v49  ;;  %v519_v49 = vmul.f32 1.442695, %v264_v43 }
  0xa5   : > { %v995_v63 = vpop.eup %994  ;;  %616 = vst [vmem:[%s1308_s17 + $0x2f8] sm:$0xff] %v993_v60  ;;  %1014 = vpow2.f32 %v477_v52 }
  0xa6   : > { %v997_v2 = vpop.eup %996  ;;  %617 = vst [vmem:[%s1308_s17 + $0x300] sm:$0xff] %v995_v63  ;;  %1016 = vpow2.f32 %v479_v55 }
  0xa7   : > { %v999_v5 = vpop.eup %998  ;;  %618 = vst [vmem:[%s1308_s17 + $0x308] sm:$0xff] %v997_v2  ;;  %1018 = vpow2.f32 %v481_v58 }
  0xa8   : > { %v1001_v8 = vpop.eup %1000  ;;  %619 = vst [vmem:[%s1308_s17 + $0x310] sm:$0xff] %v999_v5  ;;  %1020 = vpow2.f32 %v483_v61 }
  0xa9   : > { %v1003_v11 = vpop.eup %1002  ;;  %620 = vst [vmem:[%s1308_s17 + $0x318] sm:$0xff] %v1001_v8  ;;  %1022 = vpow2.f32 %v485_v0 }
  0xaa   : > { %v1005_v14 = vpop.eup %1004  ;;  %621 = vst [vmem:[%s1308_s17 + $0x320] sm:$0xff] %v1003_v11  ;;  %1024 = vpow2.f32 %v487_v3 }
  0xab   : > { %v1007_v17 = vpop.eup %1006  ;;  %622 = vst [vmem:[%s1308_s17 + $0x328] sm:$0xff] %v1005_v14  ;;  %1026 = vpow2.f32 %v489_v6 }
  0xac   : > { %v1009_v20 = vpop.eup %1008  ;;  %623 = vst [vmem:[%s1308_s17 + $0x330] sm:$0xff] %v1007_v17  ;;  %1028 = vpow2.f32 %v491_v9 }
  0xad   : > { %v1011_v23 = vpop.eup %1010  ;;  %624 = vst [vmem:[%s1308_s17 + $0x338] sm:$0xff] %v1009_v20  ;;  %1030 = vpow2.f32 %v493_v12 }
  0xae   : > { %v1013_v26 = vpop.eup %1012  ;;  %625 = vst [vmem:[%s1308_s17 + $0x340] sm:$0xff] %v1011_v23  ;;  %1032 = vpow2.f32 %v495_v15 }
  0xaf   : > { %v1015_v29 = vpop.eup %1014  ;;  %626 = vst [vmem:[%s1308_s17 + $0x348] sm:$0xff] %v1013_v26  ;;  %1034 = vpow2.f32 %v497_v18 }
  0xb0   : > { %v1017_v32 = vpop.eup %1016  ;;  %627 = vst [vmem:[%s1308_s17 + $0x350] sm:$0xff] %v1015_v29  ;;  %1036 = vpow2.f32 %v499_v21 }
  0xb1   : > { %v1019_v35 = vpop.eup %1018  ;;  %628 = vst [vmem:[%s1308_s17 + $0x358] sm:$0xff] %v1017_v32  ;;  %1038 = vpow2.f32 %v501_v24 }
  0xb2   : > { %v1021_v38 = vpop.eup %1020  ;;  %629 = vst [vmem:[%s1308_s17 + $0x360] sm:$0xff] %v1019_v35  ;;  %1040 = vpow2.f32 %v503_v27 }
  0xb3   : > { %v1023_v41 = vpop.eup %1022  ;;  %630 = vst [vmem:[%s1308_s17 + $0x368] sm:$0xff] %v1021_v38  ;;  %1042 = vpow2.f32 %v505_v30 }
  0xb4   : > { %v1025_v44 = vpop.eup %1024  ;;  %631 = vst [vmem:[%s1308_s17 + $0x370] sm:$0xff] %v1023_v41  ;;  %1044 = vpow2.f32 %v507_v33 }
  0xb5   : > { %v1027_v46 = vpop.eup %1026  ;;  %632 = vst [vmem:[%s1308_s17 + $0x378] sm:$0xff] %v1025_v44  ;;  %1046 = vpow2.f32 %v509_v36 }
  0xb6   : > { %v1029_v48 = vpop.eup %1028  ;;  %633 = vst [vmem:[%s1308_s17 + $0x380] sm:$0xff] %v1027_v46  ;;  %1048 = vpow2.f32 %v511_v39 }
  0xb7   : > { %v1031_v50 = vpop.eup %1030  ;;  %634 = vst [vmem:[%s1308_s17 + $0x388] sm:$0xff] %v1029_v48  ;;  %1050 = vpow2.f32 %v513_v42 }
  0xb8   : > { %v1033_v51 = vpop.eup %1032  ;;  %635 = vst [vmem:[%s1308_s17 + $0x390] sm:$0xff] %v1031_v50  ;;  %1052 = vpow2.f32 %v515_v45 }
  0xb9   : > { %v1035_v52 = vpop.eup %1034  ;;  %636 = vst [vmem:[%s1308_s17 + $0x398] sm:$0xff] %v1033_v51  ;;  %1054 = vpow2.f32 %v517_v47 }
  0xba   : > { %v1037_v53 = vpop.eup %1036  ;;  %637 = vst [vmem:[%s1308_s17 + $0x3a0] sm:$0xff] %v1035_v52  ;;  %1056 = vpow2.f32 %v519_v49 }
  0xbb   : > { %v1039_v54 = vpop.eup %1038  ;;  %638 = vst [vmem:[%s1308_s17 + $0x3a8] sm:$0xff] %v1037_v53 }
  0xbc   : > { %v1041_v55 = vpop.eup %1040  ;;  %639 = vst [vmem:[%s1308_s17 + $0x3b0] sm:$0xff] %v1039_v54 }
  0xbd   : > { %v1043_v56 = vpop.eup %1042  ;;  %640 = vst [vmem:[%s1308_s17 + $0x3b8] sm:$0xff] %v1041_v55 }
  0xbe   : > { %v1045_v57 = vpop.eup %1044  ;;  %641 = vst [vmem:[%s1308_s17 + $0x3c0] sm:$0xff] %v1043_v56 }
  0xbf   : > { %v1047_v58 = vpop.eup %1046  ;;  %642 = vst [vmem:[%s1308_s17 + $0x3c8] sm:$0xff] %v1045_v57 }
  0xc0   : > { %v1049_v59 = vpop.eup %1048  ;;  %643 = vst [vmem:[%s1308_s17 + $0x3d0] sm:$0xff] %v1047_v58 }
  0xc1   : > { %v1051_v60 = vpop.eup %1050  ;;  %644 = vst [vmem:[%s1308_s17 + $0x3d8] sm:$0xff] %v1049_v59 }
  0xc2   : > { %v1053_v61 = vpop.eup %1052  ;;  %645 = vst [vmem:[%s1308_s17 + $0x3e0] sm:$0xff] %v1051_v60 }
  0xc3   : > { %v1055_v62 = vpop.eup %1054  ;;  %646 = vst [vmem:[%s1308_s17 + $0x3e8] sm:$0xff] %v1053_v61 }
  0xc4   : > { %v1057_v63 = vpop.eup %1056  ;;  %647 = vst [vmem:[%s1308_s17 + $0x3f0] sm:$0xff] %v1055_v62 }
  0xc5   : > { %648 = vst [vmem:[%s1308_s17 + $0x3f8] sm:$0xff] %v1057_v63 }
  0xc6   : > { %1101 = shalt.err (!%p1098_p2)
}
  0xc7   : > { %s1102_s13 = scalar_lea.hbm %s1549_s2, 16384  ;;  %s1106_s20 = scalar_lea.hbm %s1600_s1, 32768 }
  0xc8   : > { %p1103_p4 = scmp.ne.s32.totalorder %s1549_s2, %s1102_s13  ;;  %p1107_p9 = scmp.lt.u32.totalorder %s1549_s2, %s1600_s1 }
  0xc9   : > { %p1108_p1 = scmp.lt.u32.totalorder %s1106_s20, %s1102_s13  ;;  %p1110_p6 = scmp.lt.u32.totalorder %s1102_s13, %s1549_s2 }
  0xca   : > { %p1104_p5 = pnand %p1103_p4, %p1607_p11 }
  0xcb   : > { %p1109_p3 = por %p1108_p1, %p1107_p9 }
  0xcc   : > { %p1105_p7 = pneg %p1104_p5 }
  0xcd   : > { %p1111_p12 = por %p1110_p6, %p1109_p3 }
  0xcf   : > { %p1112_p13 = pnand %p1111_p12, %p1105_p7 }
  0xd1   : > { %1115 = shalt.err (!%p1112_p13)
}
  0xd2   : > { %s1160_s24 = smov 128   ;;  %s1161_s26 = smov 8  }
  0xd3   : > { %754 = dma.vmem_to_hbm [thread:$0]  (%p1607_p11), %s1552_s27, 16384, %s1549_s2, %s650_s10, %s1160_s24, %s1160_s24, %s1161_s26  }
  0xd4 PF: > { %s678_s30 = sand.u32 1, %s1142_s6   ;;  %p1608_p8 = scmp.ne.s32.totalorder %s1605_s19, 0 }
  0xd5   : > { %p1609_p10 = scmp.ge.s32.totalorder %s1154_s9, 2  ;;  %s679_s17 = scalar_lea.sflag [#allocation4], %s678_s30 }
  0xd7   : > { %p761_p0 = pnand %p1609_p10, %p1608_p8 }
  0xd9   : > { %1137 = dma.done.wait (!%p761_p0), %s679_s17, 16384  }
  0xda   : > { %1139 = vsyncadd (!%p761_p0), %s679_s17, 4294950912  ;;  %p14_p2 = scmp.ge.s32.totalorder %s1197_s12, 4   ;;  %s1610_s6 = smov %s1146_s7 }
  0xdb   : > { %s1611_s7 = smov %s1150_s8  ;;  %s1612_s8 = smov %s1209_s15 }
  0xdc   : > { %s1613_s9 = smov %s1197_s12  ;;  %16 = sbr.rel (!%p14_p2) target bundleno = 5 (0x5), region = 69 }
  0xe3   :  { %684 = vsyncpa [#allocation3], 1 }
  0xe4   :  { %686 = vsyncpa [#allocation3 + $0x1], 1 }
  0xe5   :  { %687 = vsyncpa [#allocation4], 1 }
  0xe6   :  { %689 = vsyncpa [#allocation4 + $0x1], 1 }

</bundles_post_ra>
